<compile_context>
chip_gen: v5e
topology: v5e:2x2
jax: 0.10.0
libtpu: 0.0.40
codegen_flags: <defaults>
</compile_context>

<pallas_src>
import math
import functools

import jax
import jax.numpy as jnp
from jax import lax
from jax.experimental import pallas as pl
from jax.experimental.pallas import tpu as pltpu


def _self_attention_kernel(x_ref, wq_ref, bq_ref, wk_ref, bk_ref, wv_ref, bv_ref,
                           atten_ref, out_ref, *, norm_fact, tq):
    qi = pl.program_id(1)
    q_start = pl.multiple_of(qi * tq, tq)

    x_full = x_ref[0]                                     # (N, D_in_pad)
    x_q = x_ref[0, pl.ds(q_start, tq), :]                 # (TQ, D_in_pad)

    # Projections on the MXU (f32 accumulate). Only the query rows of this tile are projected
    # through Wq; K/V are projected from the full sequence for this batch.
    q = jnp.dot(x_q, wq_ref[...], preferred_element_type=jnp.float32) + bq_ref[...]     # (TQ, dk)
    # TODO(synk): for very large N, tile keys with an online-softmax accumulator (flash-style)
    # and carry K/V in VMEM scratch; full-K per query tile is kept here because the module must
    # return the dense atten matrix and the toy N is tiny.
    k = jnp.dot(x_full, wk_ref[...], preferred_element_type=jnp.float32) + bk_ref[...]  # (N, dk)
    v = jnp.dot(x_full, wv_ref[...], preferred_element_type=jnp.float32) + bv_ref[...]  # (N, dv)

    # scores = Q @ K^T without materializing a transpose: contract the last dims directly.
    scores = lax.dot_general(q, k, (((1,), (1,)), ((), ())),
                             preferred_element_type=jnp.float32)                        # (TQ, N)

    # Numerically-stable softmax; the divide goes to the EUP via approximate reciprocal, and the
    # post-softmax 1/sqrt(dim_k) scale (matching the PyTorch module) is folded into that multiply.
    m = jnp.max(scores, axis=-1, keepdims=True)
    p = jnp.exp(scores - m)
    denom = jnp.sum(p, axis=-1, keepdims=True)
    atten = p * (pl.reciprocal(denom, approx=True) * norm_fact)                         # (TQ, N)

    out = jnp.dot(atten, v, preferred_element_type=jnp.float32)                         # (TQ, dv)

    atten_ref[0] = atten.astype(atten_ref.dtype)
    out_ref[0] = out.astype(out_ref.dtype)


def _pad_axis(a, axis, mult):
    pad = (-a.shape[axis]) % mult
    if pad == 0:
        return a
    widths = [(0, 0)] * a.ndim
    widths[axis] = (0, pad)
    return jnp.pad(a, widths)


def _pick_tq(n):
    for cand in (256, 128, 64, 32, 16, 8):
        if n % cand == 0:
            return cand
    return n  # block dim equal to the full array dim is always legal


def self_attention(x, wq, bq, wk, bk, wv, bv, dim_k, *, tq=None):
    """x: (B, N, D_in); w*: (D_in, D_out); b*: (1, D_out). Returns (atten, output)."""
    B, N, D_in = x.shape
    dk = wq.shape[1]
    dv = wv.shape[1]
    norm_fact = 1.0 / math.sqrt(dim_k)

    LANE = 128
    # Zero-pad feature dims to lane multiples: padded x columns hit zero weight rows, padded
    # Q/K columns contribute 0 to the score contraction, padded V columns produce 0 output
    # columns (sliced off below) -> identical math, lane-dense matmuls and stores.
    xp = _pad_axis(x, 2, LANE)
    wqp = _pad_axis(_pad_axis(wq, 0, LANE), 1, LANE)
    wkp = _pad_axis(_pad_axis(wk, 0, LANE), 1, LANE)
    wvp = _pad_axis(_pad_axis(wv, 0, LANE), 1, LANE)
    bqp = _pad_axis(bq, 1, LANE)
    bkp = _pad_axis(bk, 1, LANE)
    bvp = _pad_axis(bv, 1, LANE)
    D_in_p = xp.shape[2]
    dk_p = wqp.shape[1]
    dv_p = wvp.shape[1]

    if tq is None:
        tq = _pick_tq(N)
    assert N % tq == 0, "query tile must divide the sequence length"

    # VMEM budget estimate: double-buffered x / atten / out blocks, resident weights/biases,
    # plus in-kernel intermediates (K, V, scores, P) and headroom; clamped for v7x (64 MiB VMEM).
    est = 4 * (2 * (N * D_in_p + tq * N + tq * dv_p)
               + 2 * (2 * D_in_p * dk_p + D_in_p * dv_p + 2 * dk_p + dv_p)
               + N * (dk_p + dv_p) + 2 * tq * N + tq * dk_p)
    vmem_limit = int(min(max(est + (8 << 20), 32 << 20), 112 << 20))

    kernel = functools.partial(_self_attention_kernel, norm_fact=norm_fact, tq=tq)

    # Constant index_map in BOTH grid axes -> weights/biases stay resident in VMEM.
    resident = lambda shape: pl.BlockSpec(shape, lambda b, qi: (0, 0))

    atten, out_p = pl.pallas_call(
        kernel,
        out_shape=(
            jax.ShapeDtypeStruct((B, N, N), jnp.float32),
            jax.ShapeDtypeStruct((B, N, dv_p), jnp.float32),
        ),
        grid_spec=pltpu.PrefetchScalarGridSpec(
            num_scalar_prefetch=0,
            grid=(B, N // tq),
            in_specs=[
                pl.BlockSpec((1, N, D_in_p), lambda b, qi: (b, 0, 0)),   # x (full seq per batch)
                resident((D_in_p, dk_p)),                                # wq
                resident((1, dk_p)),                                     # bq
                resident((D_in_p, dk_p)),                                # wk
                resident((1, dk_p)),                                     # bk
                resident((D_in_p, dv_p)),                                # wv
                resident((1, dv_p)),                                     # bv
            ],
            out_specs=[
                pl.BlockSpec((1, tq, N), lambda b, qi: (b, qi, 0)),      # atten query tile
                pl.BlockSpec((1, tq, dv_p), lambda b, qi: (b, qi, 0)),   # output query tile
            ],
        ),
        compiler_params=pltpu.CompilerParams(
            dimension_semantics=("parallel", "parallel"),
            vmem_limit_bytes=vmem_limit,
        ),
    )(xp, wqp, bqp, wkp, bkp, wvp, bvp)

    out = out_p[:, :, :dv] if dv_p != dv else out_p
    return atten, out


if __name__ == "__main__":
    # Small shapes consistent with the module: batch=2, seq=8, input_dim=32, dim_k=32, dim_v=32
    B, N, D_in, dim_k, dim_v = 2, 8, 32, 32, 32

    key = jax.random.PRNGKey(0)
    k_x, k_wq, k_bq, k_wk, k_bk, k_wv, k_bv = jax.random.split(key, 7)

    x = jax.random.normal(k_x, (B, N, D_in), dtype=jnp.float32)

    # Deterministic parameter init (uniform, like nn.Linear default range), stored as (D_in, D_out)
    def init_linear(kw, kb, fan_in, fan_out):
        bound = 1.0 / math.sqrt(fan_in)
        w = jax.random.uniform(kw, (fan_in, fan_out), jnp.float32, -bound, bound)
        b = jax.random.uniform(kb, (1, fan_out), jnp.float32, -bound, bound)
        return w, b

    wq, bq = init_linear(k_wq, k_bq, D_in, dim_k)
    wk, bk = init_linear(k_wk, k_bk, D_in, dim_k)
    wv, bv = init_linear(k_wv, k_bv, D_in, dim_v)

    atten, out = self_attention(x, wq, bq, wk, bk, wv, bv, dim_k)
    jax.block_until_ready((atten, out))

    # Pure-JAX reference check (tolerance loosened slightly for the approximate EUP reciprocal).
    Q = x @ wq + bq
    K = x @ wk + bk
    V = x @ wv + bv
    scores = jnp.einsum("bnd,bmd->bnm", Q, K)
    atten_ref = jax.nn.softmax(scores, axis=-1) * (1.0 / math.sqrt(dim_k))
    out_ref = jnp.einsum("bnm,bmd->bnd", atten_ref, V)
    assert jnp.allclose(atten, atten_ref, atol=5e-3, rtol=5e-3), "atten mismatch"
    assert jnp.allclose(out, out_ref, atol=5e-3, rtol=5e-3), "output mismatch"

    print("KERNEL_OK")
</pallas_src>

<mosaic_0001>
module attributes {stable_mosaic.version = 11 : i64} {
  func.func @_self_attention_kernel(%arg0: i32, %arg1: i32, %arg2: memref<1x8x128xf32, #tpu.memory_space<vmem>>, %arg3: memref<128x128xf32, #tpu.memory_space<vmem>>, %arg4: memref<1x128xf32, #tpu.memory_space<vmem>>, %arg5: memref<128x128xf32, #tpu.memory_space<vmem>>, %arg6: memref<1x128xf32, #tpu.memory_space<vmem>>, %arg7: memref<128x128xf32, #tpu.memory_space<vmem>>, %arg8: memref<1x128xf32, #tpu.memory_space<vmem>>, %arg9: memref<1x8x8xf32, #tpu.memory_space<vmem>>, %arg10: memref<1x8x128xf32, #tpu.memory_space<vmem>>) attributes {dimension_semantics = [#tpu.dimension_semantics<parallel>, #tpu.dimension_semantics<parallel>], iteration_bounds = array<i64: 2, 1>, scalar_prefetch = 0 : i64, scratch_operands = 0 : i64, tpu.core_type = #tpu.core_type<tc>, window_params = [{transform_indices = @transform_0, window_bounds = array<i64: 1, 8, 128>}, {pipeline_mode = #tpu.pipeline_mode<synchronous>, transform_indices = @transform_1, window_bounds = array<i64: 128, 128>}, {pipeline_mode = #tpu.pipeline_mode<synchronous>, transform_indices = @transform_2, window_bounds = array<i64: 1, 128>}, {pipeline_mode = #tpu.pipeline_mode<synchronous>, transform_indices = @transform_3, window_bounds = array<i64: 128, 128>}, {pipeline_mode = #tpu.pipeline_mode<synchronous>, transform_indices = @transform_4, window_bounds = array<i64: 1, 128>}, {pipeline_mode = #tpu.pipeline_mode<synchronous>, transform_indices = @transform_5, window_bounds = array<i64: 128, 128>}, {pipeline_mode = #tpu.pipeline_mode<synchronous>, transform_indices = @transform_6, window_bounds = array<i64: 1, 128>}, {transform_indices = @transform_7, window_bounds = array<i64: 1, 8, 8>}, {transform_indices = @transform_8, window_bounds = array<i64: 1, 8, 128>}]} {
    %c8_i32 = arith.constant 8 : i32
    %0 = arith.muli %arg1, %c8_i32 : i32
    %1 = tpu.assume_multiple %0, 8 : i32
    %c0 = arith.constant 0 : index
    %c0_0 = arith.constant 0 : index
    %c0_1 = arith.constant 0 : index
    %2 = vector.load %arg2[%c0, %c0_0, %c0_1] : memref<1x8x128xf32, #tpu.memory_space<vmem>>, vector<1x8x128xf32>
    %3 = vector.shape_cast %2 : vector<1x8x128xf32> to vector<8x128xf32>
    %c0_2 = arith.constant 0 : index
    %4 = arith.index_cast %1 : i32 to index
    %c0_3 = arith.constant 0 : index
    %5 = vector.load %arg2[%c0_2, %4, %c0_3] : memref<1x8x128xf32, #tpu.memory_space<vmem>>, vector<1x8x128xf32>
    %6 = vector.shape_cast %5 : vector<1x8x128xf32> to vector<8x128xf32>
    %c0_4 = arith.constant 0 : index
    %c0_5 = arith.constant 0 : index
    %7 = vector.load %arg3[%c0_4, %c0_5] : memref<128x128xf32, #tpu.memory_space<vmem>>, vector<128x128xf32>
    %cst = arith.constant dense<0.000000e+00> : vector<8x128xf32>
    %8 = tpu.matmul %6, %7, %cst {dimension_numbers = #tpu.dot_dimension_numbers<[1], [0], [0], [1], [0, 0, 1, 1], [], []>} : vector<8x128xf32>, vector<128x128xf32>, vector<8x128xf32> -> vector<8x128xf32>
    %c0_6 = arith.constant 0 : index
    %c0_7 = arith.constant 0 : index
    %9 = vector.load %arg4[%c0_6, %c0_7] : memref<1x128xf32, #tpu.memory_space<vmem>>, vector<1x128xf32>
    %10 = vector.broadcast %9 : vector<1x128xf32> to vector<8x128xf32>
    %11 = arith.addf %8, %10 : vector<8x128xf32>
    %c0_8 = arith.constant 0 : index
    %c0_9 = arith.constant 0 : index
    %12 = vector.load %arg5[%c0_8, %c0_9] : memref<128x128xf32, #tpu.memory_space<vmem>>, vector<128x128xf32>
    %cst_10 = arith.constant dense<0.000000e+00> : vector<8x128xf32>
    %13 = tpu.matmul %3, %12, %cst_10 {dimension_numbers = #tpu.dot_dimension_numbers<[1], [0], [0], [1], [0, 0, 1, 1], [], []>} : vector<8x128xf32>, vector<128x128xf32>, vector<8x128xf32> -> vector<8x128xf32>
    %c0_11 = arith.constant 0 : index
    %c0_12 = arith.constant 0 : index
    %14 = vector.load %arg6[%c0_11, %c0_12] : memref<1x128xf32, #tpu.memory_space<vmem>>, vector<1x128xf32>
    %15 = vector.broadcast %14 : vector<1x128xf32> to vector<8x128xf32>
    %16 = arith.addf %13, %15 : vector<8x128xf32>
    %c0_13 = arith.constant 0 : index
    %c0_14 = arith.constant 0 : index
    %17 = vector.load %arg7[%c0_13, %c0_14] : memref<128x128xf32, #tpu.memory_space<vmem>>, vector<128x128xf32>
    %cst_15 = arith.constant dense<0.000000e+00> : vector<8x128xf32>
    %18 = tpu.matmul %3, %17, %cst_15 {dimension_numbers = #tpu.dot_dimension_numbers<[1], [0], [0], [1], [0, 0, 1, 1], [], []>} : vector<8x128xf32>, vector<128x128xf32>, vector<8x128xf32> -> vector<8x128xf32>
    %c0_16 = arith.constant 0 : index
    %c0_17 = arith.constant 0 : index
    %19 = vector.load %arg8[%c0_16, %c0_17] : memref<1x128xf32, #tpu.memory_space<vmem>>, vector<1x128xf32>
    %20 = vector.broadcast %19 : vector<1x128xf32> to vector<8x128xf32>
    %21 = arith.addf %18, %20 : vector<8x128xf32>
    %cst_18 = arith.constant dense<0.000000e+00> : vector<8x8xf32>
    %22 = tpu.matmul %11, %16, %cst_18 {dimension_numbers = #tpu.dot_dimension_numbers<[1], [1], [0], [0], [0, 0, 1, 0], [], []>} : vector<8x128xf32>, vector<8x128xf32>, vector<8x8xf32> -> vector<8x8xf32>
    %cst_19 = arith.constant dense<0xFF800000> : vector<8xf32>
    %23 = vector.multi_reduction <maximumf>, %22, %cst_19 [1] : vector<8x8xf32> to vector<8xf32>
    %24 = vector.shape_cast %23 : vector<8xf32> to vector<8x1xf32>
    %25 = vector.broadcast %24 : vector<8x1xf32> to vector<8x8xf32>
    %26 = arith.subf %22, %25 : vector<8x8xf32>
    %27 = math.exp %26 : vector<8x8xf32>
    %cst_20 = arith.constant dense<0.000000e+00> : vector<8xf32>
    %28 = vector.multi_reduction <add>, %27, %cst_20 [1] : vector<8x8xf32> to vector<8xf32>
    %29 = vector.shape_cast %28 : vector<8xf32> to vector<8x1xf32>
    %30 = tpu.reciprocal %29 {approx = true} : vector<8x1xf32> -> vector<8x1xf32>
    %cst_21 = arith.constant 0.176776692 : f32
    %31 = vector.broadcast %cst_21 : f32 to vector<8x1xf32>
    %32 = arith.mulf %30, %31 : vector<8x1xf32>
    %33 = vector.broadcast %32 : vector<8x1xf32> to vector<8x8xf32>
    %34 = arith.mulf %27, %33 : vector<8x8xf32>
    %cst_22 = arith.constant dense<0.000000e+00> : vector<8x128xf32>
    %35 = tpu.matmul %34, %21, %cst_22 {dimension_numbers = #tpu.dot_dimension_numbers<[1], [0], [0], [1], [0, 0, 1, 1], [], []>} : vector<8x8xf32>, vector<8x128xf32>, vector<8x128xf32> -> vector<8x128xf32>
    %c0_23 = arith.constant 0 : index
    %c0_24 = arith.constant 0 : index
    %c0_25 = arith.constant 0 : index
    %36 = vector.load %arg9[%c0_23, %c0_24, %c0_25] : memref<1x8x8xf32, #tpu.memory_space<vmem>>, vector<1x8x8xf32>
    %37 = vector.shape_cast %36 : vector<1x8x8xf32> to vector<8x8xf32>
    %38 = vector.shape_cast %34 : vector<8x8xf32> to vector<1x8x8xf32>
    tpu.vector_store %arg9[%c0_23, %c0_24, %c0_25], %38 {strides = array<i32>} : memref<1x8x8xf32, #tpu.memory_space<vmem>>, vector<1x8x8xf32>,
    %c0_26 = arith.constant 0 : index
    %c0_27 = arith.constant 0 : index
    %c0_28 = arith.constant 0 : index
    %39 = vector.load %arg10[%c0_26, %c0_27, %c0_28] : memref<1x8x128xf32, #tpu.memory_space<vmem>>, vector<1x8x128xf32>
    %40 = vector.shape_cast %39 : vector<1x8x128xf32> to vector<8x128xf32>
    %41 = vector.shape_cast %35 : vector<8x128xf32> to vector<1x8x128xf32>
    tpu.vector_store %arg10[%c0_26, %c0_27, %c0_28], %41 {strides = array<i32>} : memref<1x8x128xf32, #tpu.memory_space<vmem>>, vector<1x8x128xf32>,
    return
  }
  func.func @transform_0(%arg0: i32, %arg1: i32) -> (i32, i32, i32) {
    %c0_i32 = arith.constant 0 : i32
    %c0_i32_0 = arith.constant 0 : i32
    %c0_i32_1 = arith.constant 0 : i32
    return %arg0, %c0_i32, %c0_i32_0 : i32, i32, i32
  }
  func.func @transform_1(%arg0: i32, %arg1: i32) -> (i32, i32) {
    %c0_i32 = arith.constant 0 : i32
    %c0_i32_0 = arith.constant 0 : i32
    %c0_i32_1 = arith.constant 0 : i32
    return %c0_i32, %c0_i32_0 : i32, i32
  }
  func.func @transform_2(%arg0: i32, %arg1: i32) -> (i32, i32) {
    %c0_i32 = arith.constant 0 : i32
    %c0_i32_0 = arith.constant 0 : i32
    %c0_i32_1 = arith.constant 0 : i32
    return %c0_i32, %c0_i32_0 : i32, i32
  }
  func.func @transform_3(%arg0: i32, %arg1: i32) -> (i32, i32) {
    %c0_i32 = arith.constant 0 : i32
    %c0_i32_0 = arith.constant 0 : i32
    %c0_i32_1 = arith.constant 0 : i32
    return %c0_i32, %c0_i32_0 : i32, i32
  }
  func.func @transform_4(%arg0: i32, %arg1: i32) -> (i32, i32) {
    %c0_i32 = arith.constant 0 : i32
    %c0_i32_0 = arith.constant 0 : i32
    %c0_i32_1 = arith.constant 0 : i32
    return %c0_i32, %c0_i32_0 : i32, i32
  }
  func.func @transform_5(%arg0: i32, %arg1: i32) -> (i32, i32) {
    %c0_i32 = arith.constant 0 : i32
    %c0_i32_0 = arith.constant 0 : i32
    %c0_i32_1 = arith.constant 0 : i32
    return %c0_i32, %c0_i32_0 : i32, i32
  }
  func.func @transform_6(%arg0: i32, %arg1: i32) -> (i32, i32) {
    %c0_i32 = arith.constant 0 : i32
    %c0_i32_0 = arith.constant 0 : i32
    %c0_i32_1 = arith.constant 0 : i32
    return %c0_i32, %c0_i32_0 : i32, i32
  }
  func.func @transform_7(%arg0: i32, %arg1: i32) -> (i32, i32, i32) {
    %c0_i32 = arith.constant 0 : i32
    %c0_i32_0 = arith.constant 0 : i32
    return %arg0, %arg1, %c0_i32 : i32, i32, i32
  }
  func.func @transform_8(%arg0: i32, %arg1: i32) -> (i32, i32, i32) {
    %c0_i32 = arith.constant 0 : i32
    %c0_i32_0 = arith.constant 0 : i32
    return %arg0, %arg1, %c0_i32 : i32, i32, i32
  }
}

</mosaic_0001>

<bundles_post_ra>
// kernel: tpu_custom_call.1
= control target key start
LH: loop header
LB: loop body
LE: loop exit
PB: predicated region body
PF: predicated region fallthrough
CT: control target
= control target key end

     0   :  { %s1388_s0 = inlined_call_operand.hbm [shape: f32[2,8,128], index: 0, kind: input, shape index: {}]   ;;  %s1389_s1 = inlined_call_operand.hbm [shape: f32[128,128], index: 1, kind: input, shape index: {}]   ;;  %s1390_s2 = inlined_call_operand.vmem [shape: f32[1,128], index: 2, kind: input, shape index: {}]   ;;  %s1391_s3 = inlined_call_operand.hbm [shape: f32[128,128], index: 3, kind: input, shape index: {}]   ;;  %s1392_s4 = inlined_call_operand.vmem [shape: f32[1,128], index: 4, kind: input, shape index: {}]   ;;  %s1393_s5 = inlined_call_operand.hbm [shape: f32[128,128], index: 5, kind: input, shape index: {}]   ;;  %s1394_s6 = inlined_call_operand.vmem [shape: f32[1,128], index: 6, kind: input, shape index: {}]   ;;  %s1395_s7 = inlined_call_operand.hbm [shape: f32[2,8,8], index: 7, kind: output, shape index: {0}]   ;;  %s1396_s8 = inlined_call_operand.hbm [shape: f32[2,8,128], index: 8, kind: output, shape index: {1}]  }
   0x1   :  { %1397 = sst [smem:[#allocation18_spill]] %s1388_s0 }
   0x2   :  { %1398 = sst [smem:[#allocation19_spill]] %s1389_s1 }
   0x3   :  { %1399 = sst [smem:[#allocation20_spill]] %s1391_s3 }
   0x4   :  { %1400 = sst [smem:[#allocation21_spill]] %s1393_s5 }
   0x5   :  { %14 = vsyncpa [#allocation3], 0 }
   0x6   :  { %16 = vsyncpa [#allocation3 + $0x1], 0 }
   0x7   :  { %17 = vsyncpa [#allocation6], 0 }
   0x8   :  { %18 = vsyncpa [#allocation9], 0 }
   0x9   :  { %19 = vsyncpa [#allocation4], 0 }
   0xa   :  { %21 = vsyncpa [#allocation4 + $0x1], 0 }
   0xb   :  { %22 = vsyncpa [#allocation12], 0 }
   0xc   :  { %24 = vsyncpa [#allocation12 + $0x1], 0  ;;  %s1187_s27 = smov 0   ;;  %s1189_s28 = smov 0  }
   0xd   :  { %s1191_s29 = smov 0   ;;  %s1193_s30 = smov 0  }
   0xe   :  { %s1195_s9 = smov 0   ;;  %s1197_s10 = smov 0  }
   0xf LB: > { %s763_s11 = sadd.s32 4294967295, %s1135_s10   ;;  %p765_p0 = scmp.ge.s32.totalorder %s1135_s10, 1  ;;  %s1135_s10 = sphi %s1197_s10, %s30_s10   ;;  %s1131_s9 = sphi %s1195_s9, %s1416_s9   ;;  %s1127_s30 = sphi %s1193_s30, %s1415_s30   ;;  %s1123_s29 = sphi %s1191_s29, %s1414_s29   ;;  %s1119_s28 = sphi %s1189_s28, %s1413_s28   ;;  %s1115_s27 = sphi %s1187_s27, %s1412_s27  }
  0x10   : > { %p1221_p1 = scmp.eq.s32.totalorder %s763_s11, 0  ;;  %p255_p2 = scmp.lt.s32.totalorder %s1135_s10, 3 }
  0x11   : > { %s1402_s1 = sld [smem:[#allocation19_spill]]  ;;  %s1137_s17 = smov [#allocation5]  }
  0x12   : > { %p1229_p3 = pnand %p765_p0, %p255_p2  ;;  %s268_s18 = sshll.u32 %s1137_s17, 4  ;;  %s269_s18 = int_to_ptr.vmem [resolvable:$true] %s268_s18 }
  0x13   : > { %p769_p6 = scmp.ge.s32.totalorder %s1135_s10, 2  ;;  %s1405_s3 = sld [smem:[#allocation20_spill]] }
  0x14   : > { %p804_p4 = pneg %p1229_p3  ;;  %s1138_s23 = smov 128  }
  0x15   : > { %s1139_s24 = smov 8   ;;  %s1140_s25 = smov [#allocation7]  }
  0x16   : > { %p1237_p5 = pnand %p804_p4, %p1221_p1  ;;  %s285_s26 = sshll.u32 %s1140_s25, 4  ;;  %s286_s26 = int_to_ptr.vmem [resolvable:$true] %s285_s26 }
  0x17   : > { %s266_s15 = sshll.u32 %s1402_s1, 4  ;;  %s1406_s5 = sld [smem:[#allocation21_spill]]  ;;  %s267_s15 = int_to_ptr.hbm [resolvable:$true] %s266_s15 }
  0x18   : > { %807 = dma.hbm_to_vmem [thread:$0]  (!%p1237_p5), %s267_s15, 2048, %s269_s18, [#allocation6], %s1138_s23, %s1138_s23, %s1139_s24  }
  0x19   : > { %s283_s22 = sshll.u32 %s1405_s3, 4  ;;  %s1141_s20 = smov [#allocation8]   ;;  %s284_s22 = int_to_ptr.hbm [resolvable:$true] %s283_s22 }
  0x1a   : > { %810 = dma.hbm_to_vmem [thread:$0]  (!%p1237_p5), %s284_s22, 2048, %s286_s26, [#allocation6], %s1138_s23, %s1138_s23, %s1139_s24  }
  0x1b   : > { %s302_s21 = sshll.u32 %s1141_s20, 4  ;;  %s764_s15 = sadd.s32 4294967294, %s1135_s10   ;;  %s303_s21 = int_to_ptr.vmem [resolvable:$true] %s302_s21 }
  0x1c   : > { %s42_s18 = sadd.s32 1, %s1131_s9  ;;  %s49_s25 = sadd.s32 1, %s1123_s29 }
  0x1d   : > { %s300_s17 = sshll.u32 %s1406_s5, 4  ;;  %p44_p7 = scmp.ge.s32.totalorder %s42_s18, 2  ;;  %s301_s17 = int_to_ptr.hbm [resolvable:$true] %s300_s17 }
  0x1e   : > { %813 = dma.hbm_to_vmem [thread:$0]  (!%p1237_p5), %s301_s17, 2048, %s303_s21, [#allocation9], %s1138_s23, %s1138_s23, %s1139_s24  }
  0x1f   : > { %p56_p8 = scmp.ne.s32.totalorder %s1123_s29, %s1119_s28  ;;  %p57_p9 = scmp.eq.s32.totalorder %s1135_s10, 0 }
  0x20   : > { %p62_p10 = scmp.ne.s32.totalorder %s1119_s28, %s1115_s27  ;;  %s1418_s18 = smov (%p44_p7, %s42_s18), 0 }
  0x21   : > { %p1264_p11 = por %p57_p9, %p56_p8  ;;  %s46_s23 = ssub.s32 %s1131_s9, %s1418_s18 }
  0x22   : > { %p1270_p12 = por %p1221_p1, %p62_p10  ;;  %p214_p13 = scmp.eq.s32.totalorder %s763_s11, 1 }
  0x23   : > { %p47_p0 = scmp.eq.s32.totalorder %s46_s23, 0  ;;  %p220_p2 = scmp.eq.s32.totalorder %s764_s15, 1 }
  0x24   : > { %p1278_p4 = por %p214_p13, %p56_p8  ;;  %p828_p5 = scmp.lt.s32.totalorder %s1135_s10, 2 }
  0x25   : > { %s1284_s26 = scalar_select %p47_p0, %s1123_s29, %s49_s25  }
  0x26   : > { %p1286_p7 = por %p220_p2, %p62_p10  ;;  %s319_s14 = sand.u32 1, %s1123_s29  }
  0x27   : > { %s770_s17 = sshll.u32 %s319_s14, 3  ;;  %s771_s20 = sshll.u32 %s1131_s9, 3 }
  0x28   : > { %s1411_s0 = sld [smem:[#allocation18_spill]]  ;;  %s323_s23 = scalar_lea.vmem [#allocation2], %s770_s17 }
  0x29   : > { %s331_s15 = sshll.u32 %s323_s23, 4  ;;  %p815_p8 = pnand %p828_p5, %p1264_p11  ;;  %s332_s15 = int_to_ptr.vmem [resolvable:$true] %s331_s15 }
  0x2a   : > { %s320_s25 = scalar_lea.sflag [#allocation3], %s319_s14  ;;  %s1300_s5 = sand.u32 (!%p1229_p3), 1, %s1119_s28  }
  0x2b   : > { %s1303_s1 = sshll.u32 (!%p1229_p3), %s1300_s5, 3  ;;  %s343_s17 = scalar_lea.sflag (!%p1229_p3), [#allocation3], %s1300_s5 }
  0x2c   : > { %340 = sbr.rel (%p1229_p3) target bundleno = 740 (0x2e4), region = 48 }
  0x2e   : > { %s327_s11 = scalar_lea.hbm %s1411_s0, %s771_s20  ;;  %s346_s20 = scalar_lea.vmem (!%p1229_p3), [#allocation2], %s1303_s1 }
  0x2f   : > { %s329_s3 = sshll.u32 %s327_s11, 4  ;;  %s330_s3 = int_to_ptr.hbm [resolvable:$true] %s329_s3 }
  0x30   : > { %817 = dma.hbm_to_vmem [thread:$0]  (!%p815_p8), %s330_s3, 128, %s332_s15, %s320_s25  }
  0x31   : > { %1094 = dma.done.wait (%p1270_p12), %s343_s17, 128  }
  0x32   : > { %1096 = vsyncadd (%p1270_p12), %s343_s17, 4294967168 }
  0x33   : > { %1098 = dma.done.wait (%p1221_p1), [#allocation6], 4096  }
  0x34   : > { %1100 = vsyncadd (%p1221_p1), [#allocation6], 4294963200 }
  0x35   : > { %1102 = dma.done.wait (%p1221_p1), [#allocation9], 2048  }
  0x36   : > { %1104 = vsyncadd (%p1221_p1), [#allocation9], 4294965248  ;;  %v459_v0 = vld [vmem:[#allocation7 + $0x78] sm:$0xff]  ;;  %v458_v1 = vld [vmem:[#allocation7 + $0x70] sm:$0xff]  ;;  %vm544_vm0 = vcmask 64512   ;;  %s392_s21 = scalar_lea.vmem [#allocation10], %s1303_s1 }
  0x37   : > { %v419_v2 = vld [vmem:[#allocation5 + $0x78] sm:$0xff]  ;;  %464 = vmatpush.msra.mxu1 %v459_v0  ;;  %v418_v3 = vld [vmem:[#allocation5 + $0x70] sm:$0xff]  ;;  %v457_v4 = vld [vmem:[#allocation7 + $0x68] sm:$0xff]  ;;  %s782_s11 = sshll.u32 %s1127_s30, 3  ;;  %s601_s17 = sshll.u32 %s392_s21, 4  ;;  %s602_s17 = int_to_ptr.vmem [resolvable:$true] %s601_s17 }
  0x38   : > { %424 = vmatpush.msra.mxu0 %v419_v2  ;;  %v417_v5 = vld [vmem:[#allocation5 + $0x68] sm:$0xff]  ;;  %v456_v6 = vld [vmem:[#allocation7 + $0x60] sm:$0xff]  ;;  %v455_v8 = vld [vmem:[#allocation7 + $0x58] sm:$0xff]  ;;  %s599_s25 = scalar_lea.hbm %s1395_s7, %s782_s11  ;;  %s583_s3 = scalar_lea.sflag [#allocation4], %s1300_s5 }
  0x39   : > { %465 = vmatpush.msra.mxu1 %v458_v1  ;;  %v416_v7 = vld [vmem:[#allocation5 + $0x60] sm:$0xff]  ;;  %v415_v9 = vld [vmem:[#allocation5 + $0x58] sm:$0xff]  ;;  %v454_v10 = vld [vmem:[#allocation7 + $0x50] sm:$0xff]  ;;  %s1033_s30 = scalar_lea.hbm %s1395_s7, 16 }
  0x3a   : > { %425 = vmatpush.msra.mxu0 %v418_v3  ;;  %v414_v11 = vld [vmem:[#allocation5 + $0x50] sm:$0xff]  ;;  %v453_v12 = vld [vmem:[#allocation7 + $0x48] sm:$0xff]  ;;  %v452_v14 = vld [vmem:[#allocation7 + $0x40] sm:$0xff] }
  0x3b   : > { %466 = vmatpush.msra.mxu1 %v457_v4  ;;  %v413_v13 = vld [vmem:[#allocation5 + $0x48] sm:$0xff]  ;;  %v412_v15 = vld [vmem:[#allocation5 + $0x40] sm:$0xff]  ;;  %v451_v16 = vld [vmem:[#allocation7 + $0x38] sm:$0xff] }
  0x3c   : > { %426 = vmatpush.msra.mxu0 %v417_v5  ;;  %v411_v17 = vld [vmem:[#allocation5 + $0x38] sm:$0xff]  ;;  %v450_v18 = vld [vmem:[#allocation7 + $0x30] sm:$0xff]  ;;  %v449_v20 = vld [vmem:[#allocation7 + $0x28] sm:$0xff] }
  0x3d   : > { %467 = vmatpush.msra.mxu1 %v456_v6  ;;  %v410_v19 = vld [vmem:[#allocation5 + $0x30] sm:$0xff]  ;;  %v409_v21 = vld [vmem:[#allocation5 + $0x28] sm:$0xff]  ;;  %v448_v22 = vld [vmem:[#allocation7 + $0x20] sm:$0xff] }
  0x3e   : > { %427 = vmatpush.msra.mxu0 %v416_v7  ;;  %v408_v23 = vld [vmem:[#allocation5 + $0x20] sm:$0xff]  ;;  %v447_v24 = vld [vmem:[#allocation7 + $0x18] sm:$0xff]  ;;  %v446_v26 = vld [vmem:[#allocation7 + $0x10] sm:$0xff] }
  0x3f   : > { %468 = vmatpush.msra.mxu1 %v455_v8  ;;  %v407_v25 = vld [vmem:[#allocation5 + $0x18] sm:$0xff]  ;;  %v406_v27 = vld [vmem:[#allocation5 + $0x10] sm:$0xff]  ;;  %v445_v28 = vld [vmem:[#allocation7 + $0x8] sm:$0xff] }
  0x40   : > { %428 = vmatpush.msra.mxu0 %v415_v9  ;;  %v405_v29 = vld [vmem:[#allocation5 + $0x8] sm:$0xff]  ;;  %v444_v30 = vld [vmem:[#allocation7] sm:$0xff]  ;;  %v401_v32 = vld [vmem:[%s346_s20] sm:$0xff]  ;;  %s603_s20 = sshll.u32 %s599_s25, 4  ;;  %s604_s20 = int_to_ptr.hbm [resolvable:$true] %s603_s20 }
  0x41   : > { %469 = vmatpush.msra.mxu1 %v454_v10  ;;  %v404_v31 = vld [vmem:[#allocation5] sm:$0xff]  ;;  %v887_v33 = vld [vmem:[%s1392_s4] ss:$0 sm:$0xff]  ;;  %v499_v39 = vld [vmem:[#allocation8 + $0x78] sm:$0xff]  ;;  %s1027_s12 = sshra.s32 %s604_s20, 4  ;;  %s1028_s12 = int_to_ptr.hbm [resolvable:$true] %s1027_s12 }
  0x42   : > { %429 = vmatpush.msra.mxu0 %v414_v11  ;;  %v886_v34 = vld [vmem:[%s1390_s2] ss:$0 sm:$0xff]  ;;  %504 = vmatpush.msra.mxu2 %v499_v39  ;;  %v497_v41 = vld [vmem:[#allocation8 + $0x68] sm:$0xff]  ;;  %v496_v42 = vld [vmem:[#allocation8 + $0x60] sm:$0xff]  ;;  %s1029_s16 = scalar_lea.hbm %s1028_s12, 8  ;;  %p1034_p10 = scmp.lt.s32.totalorder %s1028_s12, %s1395_s7 }
  0x43   : > { %470 = vmatpush.msra.mxu1 %v453_v12  ;;  %v498_v40 = vld [vmem:[#allocation8 + $0x70] sm:$0xff]  ;;  %v495_v43 = vld [vmem:[#allocation8 + $0x58] sm:$0xff]  ;;  %v493_v45 = vld [vmem:[#allocation8 + $0x48] sm:$0xff]  ;;  %p1030_p1 = scmp.ne.s32.totalorder %s1028_s12, %s1029_s16  ;;  %p1035_p11 = scmp.lt.s32.totalorder %s1033_s30, %s1029_s16 }
  0x44   : > { %430 = vmatpush.msra.mxu0 %v413_v13  ;;  %505 = vmatpush.msra.mxu2 %v498_v40  ;;  %v494_v44 = vld [vmem:[#allocation8 + $0x50] sm:$0xff]  ;;  %v492_v46 = vld [vmem:[#allocation8 + $0x40] sm:$0xff]  ;;  %v491_v47 = vld [vmem:[#allocation8 + $0x38] sm:$0xff] }
  0x45   : > { %471 = vmatpush.msra.mxu1 %v452_v14  ;;  %v490_v48 = vld [vmem:[#allocation8 + $0x30] sm:$0xff]  ;;  %v489_v49 = vld [vmem:[#allocation8 + $0x28] sm:$0xff]  ;;  %v488_v50 = vld [vmem:[#allocation8 + $0x20] sm:$0xff]  ;;  %p1031_p3 = pnand %p1030_p1, %p1278_p4  ;;  %p1036_p12 = por %p1035_p11, %p1034_p10 }
  0x46   : > { %431 = vmatpush.msra.mxu0 %v412_v15  ;;  %506 = vmatpush.msra.mxu2 %v497_v41  ;;  %v487_v51 = vld [vmem:[#allocation8 + $0x18] sm:$0xff]  ;;  %v486_v52 = vld [vmem:[#allocation8 + $0x10] sm:$0xff]  ;;  %v485_v53 = vld [vmem:[#allocation8 + $0x8] sm:$0xff] }
  0x47   : > { %472 = vmatpush.msra.mxu1 %v451_v16  ;;  %v484_v54 = vld [vmem:[#allocation8] sm:$0xff]  ;;  %v888_v62 = vld [vmem:[%s1394_s6] ss:$0 sm:$0xff]  ;;  %p1032_p9 = pneg %p1031_p3 }
  0x48   : > { %432 = vmatpush.msra.mxu0 %v411_v17  ;;  %507 = vmatpush.msra.mxu2 %v496_v42 }
  0x49   : > { %473 = vmatpush.msra.mxu1 %v450_v18  ;;  %p1037_p13 = pnand %p1036_p12, %p1032_p9 }
  0x4a   : > { %433 = vmatpush.msra.mxu0 %v410_v19  ;;  %508 = vmatpush.msra.mxu2 %v495_v43 }
  0x4b   : > { %474 = vmatpush.msra.mxu1 %v449_v20 }
  0x4c   : > { %434 = vmatpush.msra.mxu0 %v409_v21  ;;  %509 = vmatpush.msra.mxu2 %v494_v44 }
  0x4d   : > { %475 = vmatpush.msra.mxu1 %v448_v22 }
  0x4e   : > { %435 = vmatpush.msra.mxu0 %v408_v23  ;;  %510 = vmatpush.msra.mxu2 %v493_v45 }
  0x4f   : > { %476 = vmatpush.msra.mxu1 %v447_v24 }
  0x50   : > { %436 = vmatpush.msra.mxu0 %v407_v25  ;;  %511 = vmatpush.msra.mxu2 %v492_v46 }
  0x51   : > { %477 = vmatpush.msra.mxu1 %v446_v26 }
  0x52   : > { %437 = vmatpush.msra.mxu0 %v406_v27  ;;  %512 = vmatpush.msra.mxu2 %v491_v47 }
  0x53   : > { %478 = vmatpush.msra.mxu1 %v445_v28 }
  0x54   : > { %438 = vmatpush.msra.mxu0 %v405_v29  ;;  %513 = vmatpush.msra.mxu2 %v490_v48 }
  0x55   : > { %479 = vmatpush.msra.mxu1 %v444_v30 }
  0x56   : > { %439 = vmatpush.msra.mxu0 %v404_v31  ;;  %480 = vmatmul.f32.vlgmr.msra.gmra.mxu1 %v401_v32 }
  0x57   : > { %440 = vmatmul.f32.vlgmr.msra.gmra.mxu0 %v401_v32  ;;  %514 = vmatpush.msra.mxu2 %v489_v49 }
  0x59   : > { %515 = vmatpush.msra.mxu2 %v488_v50 }
  0x5b   : > { %516 = vmatpush.msra.mxu2 %v487_v51 }
  0x5d   : > { %517 = vmatpush.msra.mxu2 %v486_v52 }
  0x5f   : > { %518 = vmatpush.msra.mxu2 %v485_v53 }
  0x61   : > { %519 = vmatpush.msra.mxu2 %v484_v54 }
  0x62   : > { %520 = vmatmul.f32.vlgmr.msra.gmra.mxu2 %v401_v32 }
  0xd3   : > { %v481_v35 = vpop.f32.mrf.mxu1 }
  0xd4   : > { %v441_v36 = vpop.f32.mrf.mxu0  ;;  %v482_v37 = vadd.f32 %v887_v33, %v481_v35 }
  0xd5   : > { %v442_v38 = vadd.f32 %v886_v34, %v441_v36 }
  0xd6   : > { %539 = vmatpush.xpose.msra.mxu3 %v482_v37 }
  0xd9   : > { %540 = vmatmul.f32.vlgmr.msra.gmra.mxu3 %v442_v38 }
  0xe5   : > { %v521_v63 = vpop.f32.mrf.mxu2 }
  0xe6   : > { %v522_v0 = vadd.f32 %v888_v62, %v521_v63 }
  0xe8   : > { %575 = vmatpush.msrb.mxu3 %v522_v0 }
 0x15c   : > { %v541_v55 = vpop.f32.mrf.mxu3 }
 0x15d   : > { %v545_v56 = vsel %vm544_vm0, %v541_v55, -inf }
 0x15e   : > { %546 = vmax.xlane.f32.xlu0 %v545_v56 }
 0x1d1   : > { %v547_v57 = vpop.xlane.xlu0 %546 }
 0x1d2   : > { %v548_v58 = vsub.f32 %v541_v55, %v547_v57 }
 0x1d4   : > { %v549_v59 = vmul.f32 1.442695, %v548_v58 }
 0x1d6   : > { %889 = vpow2.f32 %v549_v59 }
 0x1dc   : > { %v890_v60 = vpop.eup %889 }
 0x1dd   : > { %v551_v61 = vsel %vm544_vm0, %v890_v60, 0.0 }
 0x1de   : > { %552 = vadd.xlane.f32.xlu0 %v551_v61 }
 0x251   : > { %v553_v1 = vpop.xlane.xlu0 %552 }
 0x252   : > { %891 = vrcp.f32 %v553_v1 }
 0x258   : > { %v892_v2 = vpop.eup %891 }
 0x259   : > { %v555_v3 = vmul.f32 0.17677669, %v892_v2 }
 0x25b   : > { %v556_v4 = vmul.f32 %v890_v60, %v555_v3 }
 0x25d   : > { %779 = vmatmul.msk.f32.vlgmr.msrb.gmra.mxu3 %vm544_vm0, %v556_v4  ;;  %580 = vst.msk [vmem:[%s392_s21] sm:$0xff] %vm544_vm0, %v556_v4 }
 0x25e   : > { %1040 = shalt.err (!%p1037_p13)
}
 0x25f   : > { %800 = dma.vmem_to_hbm [thread:$0]  (%p1278_p4), %s602_s17, 128, %s604_s20, %s583_s3  }
 0x260   : > { %s614_s15 = scalar_lea.hbm %s1396_s8, %s782_s11  ;;  %s399_s25 = scalar_lea.vmem [#allocation11], %s1303_s1 }
 0x261   : > { %s616_s22 = sshll.u32 %s399_s25, 4  ;;  %s618_s19 = sshll.u32 %s614_s15, 4  ;;  %s617_s22 = int_to_ptr.vmem [resolvable:$true] %s616_s22  ;;  %s619_s19 = int_to_ptr.hbm [resolvable:$true] %s618_s19 }
 0x262   : > { %s588_s0 = scalar_lea.sflag [#allocation12], %s1300_s5  ;;  %s1055_s12 = sshra.s32 %s619_s19, 4  ;;  %s1056_s12 = int_to_ptr.hbm [resolvable:$true] %s1055_s12 }
 0x263   : > { %s1057_s16 = scalar_lea.hbm %s1056_s12, 8  ;;  %s1061_s3 = scalar_lea.hbm %s1396_s8, 16 }
 0x264   : > { %p1058_p0 = scmp.ne.s32.totalorder %s1056_s12, %s1057_s16  ;;  %p1062_p8 = scmp.lt.s32.totalorder %s1056_s12, %s1396_s8 }
 0x265   : > { %p1063_p1 = scmp.lt.s32.totalorder %s1061_s3, %s1057_s16 }
 0x266   : > { %p1059_p2 = pnand %p1058_p0, %p1278_p4 }
 0x267   : > { %p1064_p3 = por %p1063_p1, %p1062_p8 }
 0x268   : > { %p1060_p5 = pneg %p1059_p2 }
 0x26a   : > { %p1065_p9 = pnand %p1064_p3, %p1060_p5 }
 0x2e0   : > { %v577_v5 = vpop.f32.mrf.mxu3 }
 0x2e1   : > { %581 = vst [vmem:[%s399_s25] sm:$0xff] %v577_v5 }
 0x2e2   : > { %1068 = shalt.err (!%p1065_p9)
}
 0x2e3   : > { %801 = dma.vmem_to_hbm [thread:$0]  (%p1278_p4), %s617_s22, 128, %s619_s19, %s588_s0  }
 0x2e4 PF: > { %s630_s5 = sand.u32 1, %s1115_s27   ;;  %p819_p10 = pnand %p769_p6, %p1286_p7 }
 0x2e5   : > { %s631_s30 = scalar_lea.sflag [#allocation4], %s630_s5 }
 0x2e6   : > { %p820_p11 = pneg %p819_p10 }
 0x2e8   : > { %1106 = dma.done.wait (%p820_p11), %s631_s30, 128  }
 0x2e9   : > { %1108 = vsyncadd (%p820_p11), %s631_s30, 4294967168  ;;  %s641_s14 = scalar_lea.sflag [#allocation12], %s630_s5 }
 0x2ea   : > { %1110 = dma.done.wait (%p820_p11), %s641_s14, 128  }
 0x2eb   : > { %1112 = vsyncadd (%p820_p11), %s641_s14, 4294967168  ;;  %s30_s10 = sadd.s32 1, %s1135_s10   ;;  %s1412_s27 = smov %s1119_s28 }
 0x2ec   : > { %p27_p12 = scmp.ge.s32.totalorder %s30_s10, 4   ;;  %s1413_s28 = smov %s1123_s29 }
 0x2ed   : > { %s1414_s29 = smov %s1284_s26  ;;  %s1415_s30 = smov %s1131_s9 }
 0x2ee   : > { %s1416_s9 = smov %s1418_s18  ;;  %29 = sbr.rel (!%p27_p12) target bundleno = 15 (0xf), region = 123 }
 0x2f3   :  { %647 = vsyncpa [#allocation3], 1 }
 0x2f4   :  { %649 = vsyncpa [#allocation3 + $0x1], 1 }
 0x2f5   :  { %650 = vsyncpa [#allocation6], 1 }
 0x2f6   :  { %651 = vsyncpa [#allocation9], 1 }
 0x2f7   :  { %652 = vsyncpa [#allocation4], 1 }
 0x2f8   :  { %654 = vsyncpa [#allocation4 + $0x1], 1 }
 0x2f9   :  { %655 = vsyncpa [#allocation12], 1 }
 0x2fa   :  { %657 = vsyncpa [#allocation12 + $0x1], 1 }

</bundles_post_ra>
